<compile_context>
chip_gen: v7x
topology: tpu7x:2x2x1
jax: 0.10.0
libtpu: 0.0.40
codegen_flags: <defaults>
</compile_context>

<pallas_src>
import jax
import jax.numpy as jnp
from jax import lax
from jax.experimental import pallas as pl
from jax.experimental.pallas import tpu as pltpu


_LANE = 128
_TM_CAP = 1024     # row-tile cap
_TN_CAP = 512      # output-feature tile cap


def _cdiv(a, b):
    return -(-a // b)


def _rup(a, m):
    return _cdiv(a, m) * m


def _vmem_bytes(tm, tn, tk, ktiled, in_isz, out_isz):
    """Rough per-step VMEM footprint (double-buffered pipeline + scratch)."""
    b = 2 * (tm + tn) * _rup(tk, _LANE) * in_isz     # x-tile + w-tile, double buffered
    b += 2 * tm * _rup(tn, _LANE) * out_isz          # output tile, double buffered
    b += 2 * _rup(tn, _LANE) * 4                     # bias tile
    if ktiled:
        b += tm * _rup(tn, _LANE) * 4                # f32 accumulator scratch
    return b


def _select_tiles(M, D, O, in_isz, out_isz, row_align, budget):
    """Pick (tm, tn, tk, ktiled) so the pipelined working set fits `budget`."""
    tm = M if M < _TM_CAP else _TM_CAP
    tn = O if O < _TN_CAP else _TN_CAP
    Dp = _rup(D, _LANE)

    for _ in range(16):
        # Prefer a single full-D contraction block: no K grid axis, no masking.
        if _vmem_bytes(tm, tn, Dp, False, in_isz, out_isz) <= budget:
            return tm, tn, D, False
        # Otherwise K-tile: largest lane-aligned tk that fits the budget.
        fixed = _vmem_bytes(tm, tn, 0, True, in_isz, out_isz)
        per_tk = 2 * (tm + tn) * in_isz
        tk = (budget - fixed) // per_tk if per_tk > 0 else 0
        tk = (tk // _LANE) * _LANE
        tk = min(tk, 2048, Dp)
        if tk >= _LANE:
            return tm, tn, int(tk), True
        # Still doesn't fit: shrink the (tm, tn) output tile and retry.
        if tm > 256:
            tm = max(256, _rup(tm // 2, row_align))
        elif tn > _LANE:
            tn = max(_LANE, _rup(tn // 2, _LANE))
        else:
            break
    # Last resort (pathologically small budget): minimal lane-aligned tiles.
    return tm, tn, (_LANE if D > _LANE else D), (D > _LANE)


def _td_kernel(x_ref, w_ref, b_ref, o_ref):
    # x_ref: (TM, D)  w_ref: (TN, D)  b_ref: (1, TN)  o_ref: (TM, TN)
    acc = lax.dot_general(x_ref[...], w_ref[...],
                          (((1,), (1,)), ((), ())),
                          preferred_element_type=jnp.float32)
    o_ref[...] = (acc + b_ref[...]).astype(o_ref.dtype)


def _make_ktiled_kernel(D, tk):
    ragged = (D % tk) != 0

    def kernel(x_ref, w_ref, b_ref, o_ref, acc_ref):
        k = pl.program_id(2)

        @pl.when(k == 0)
        def _():
            acc_ref[...] = jnp.zeros_like(acc_ref)

        x = x_ref[...]
        w = w_ref[...]
        if ragged:
            # Mask out-of-range contraction columns in the last K block instead of
            # zero-padding D in HBM (avoids a full read+write pass over x and w).
            rem = D - k * tk
            col = lax.broadcasted_iota(jnp.int32, (1, tk), 1)
            m = col < rem
            x = jnp.where(m, x, jnp.zeros_like(x))
            w = jnp.where(m, w, jnp.zeros_like(w))

        acc_ref[...] += lax.dot_general(x, w,
                                        (((1,), (1,)), ((), ())),
                                        preferred_element_type=jnp.float32)

        @pl.when(k == pl.num_programs(2) - 1)
        def _():
            o_ref[...] = (acc_ref[...] + b_ref[...]).astype(o_ref.dtype)

    return kernel


def custom_td(x, weight, bias, *, use_bf16=False, vmem_budget_bytes=None):
    """Time-distributed linear (Conv2d(1, O, (1, D))) as a Pallas TPU kernel.

    x: (B, T, D); weight: (O, 1, 1, D) conv weight; bias: (O,).  Returns (B, T, O).
    `vmem_budget_bytes` overrides the auto-detected VMEM budget (mainly for testing).
    """
    B, T, D = x.shape
    O = weight.shape[0]
    out_dtype = x.dtype

    M = B * T
    x2 = x.reshape(M, D)
    # (O, 1, 1, D) -> (O, D): a free reshape, NOT a transpose copy.  The kernel
    # contracts x dim 1 with w dim 1, so no (D, O) copy is ever written to HBM.
    w2 = weight.reshape(O, D)
    b2 = bias.reshape(1, O).astype(jnp.float32)   # bias add stays f32 (v5e VPU has no bf16)

    if use_bf16:
        # NOTE: prefer supplying bf16 x / weight from the producer (parameter-load
        # time) so these casts fuse away instead of costing an extra HBM pass.
        x2 = x2.astype(jnp.bfloat16)
        w2 = w2.astype(jnp.bfloat16)

    in_isz = jnp.dtype(x2.dtype).itemsize
    out_isz = jnp.dtype(out_dtype).itemsize
    row_align = 16 if in_isz == 2 else 8

    # Per-generation VMEM budget: ~100 MiB on 128 MiB parts (v5e/v6e),
    # ~48 MiB on the 64 MiB part (v7x); leaves headroom for Mosaic internals.
    try:
        vmem_cap = int(pltpu.get_tpu_info().vmem_capacity_bytes)
    except Exception:
        vmem_cap = 64 << 20
    budget = max(min(vmem_cap - (16 << 20), int(vmem_cap * 0.8)), 16 << 20)
    if vmem_budget_bytes is not None:
        budget = int(vmem_budget_bytes)

    tm, tn, tk, ktiled = _select_tiles(M, D, O, in_isz, out_isz, row_align, budget)

    num_m = _cdiv(M, tm)
    num_n = _cdiv(O, tn)

    # Small shapes collapse to a single-step grid; split one parallel axis so a
    # second TensorCore (v7x megacore) has work.  Harmless (~0.35 us) elsewhere.
    if num_m == 1 and num_n == 1:
        if O >= 2 * _LANE:
            tn = _rup(_cdiv(O, 2), _LANE)
            num_n = _cdiv(O, tn)
        elif M >= 2 * row_align:
            tm = _rup(_cdiv(M, 2), row_align)
            num_m = _cdiv(M, tm)

    # Operand-reuse aware grid order: the inner non-reduction axis re-streams the
    # operand it indexes, so keep the operand with the larger re-stream cost outer.
    x_bytes = M * D * in_isz
    w_bytes = O * D * in_isz
    m_outer = (num_m - 1) * w_bytes <= (num_n - 1) * x_bytes

    if ktiled:
        num_k = _cdiv(D, tk)
        grid = (num_m, num_n, num_k) if m_outer else (num_n, num_m, num_k)
        if m_outer:
            x_map = lambda i, j, k: (i, k)
            w_map = lambda i, j, k: (j, k)
            b_map = lambda i, j, k: (0, j)
            o_map = lambda i, j, k: (i, j)
        else:
            x_map = lambda j, i, k: (i, k)
            w_map = lambda j, i, k: (j, k)
            b_map = lambda j, i, k: (0, j)
            o_map = lambda j, i, k: (i, j)
        kernel = _make_ktiled_kernel(D, tk)
        scratch = [pltpu.VMEM((tm, tn), jnp.float32)]
        dims = ("parallel", "parallel", "arbitrary")
    else:
        grid = (num_m, num_n) if m_outer else (num_n, num_m)
        if m_outer:
            x_map = lambda i, j: (i, 0)
            w_map = lambda i, j: (j, 0)
            b_map = lambda i, j: (0, j)
            o_map = lambda i, j: (i, j)
        else:
            x_map = lambda j, i: (i, 0)
            w_map = lambda j, i: (j, 0)
            b_map = lambda j, i: (0, j)
            o_map = lambda j, i: (i, j)
        kernel = _td_kernel
        scratch = []
        dims = ("parallel", "parallel")

    est = _vmem_bytes(tm, tn, tk, ktiled, in_isz, out_isz)
    vmem_limit = int(min(vmem_cap, max(32 << 20, est + (8 << 20))))

    out2 = pl.pallas_call(
        kernel,
        out_shape=jax.ShapeDtypeStruct((M, O), out_dtype),
        grid_spec=pltpu.PrefetchScalarGridSpec(
            num_scalar_prefetch=0,
            grid=grid,
            in_specs=[
                pl.BlockSpec((tm, tk), x_map),   # x row tile
                pl.BlockSpec((tn, tk), w_map),   # weight tile, kept in (O, D) layout
                pl.BlockSpec((1, tn), b_map),    # bias (single whole block when num_n == 1)
            ],
            out_specs=pl.BlockSpec((tm, tn), o_map),
            scratch_shapes=scratch,
        ),
        compiler_params=pltpu.CompilerParams(
            dimension_semantics=dims,
            vmem_limit_bytes=vmem_limit,
        ),
        cost_estimate=pl.CostEstimate(
            flops=2 * M * D * O,
            transcendentals=0,
            bytes_accessed=(M * D + O * D) * in_isz + M * O * out_isz + O * 4,
        ),
    )(x2, w2, b2)

    return out2.reshape(B, T, O)


if __name__ == "__main__":
    # Small shapes consistent with the module: batch=2, seq=8, input_dim=32, output_dim=16
    B, T, D, O = 2, 8, 32, 16

    key = jax.random.PRNGKey(0)
    kx, kw, kb = jax.random.split(key, 3)

    x = jax.random.normal(kx, (B, T, D), dtype=jnp.float32)
    # Deterministic synthetic conv parameters (shape matches nn.Conv2d(1, O, (1, D)))
    weight = jax.random.normal(kw, (O, 1, 1, D), dtype=jnp.float32) * 0.05
    bias = jax.random.normal(kb, (O,), dtype=jnp.float32) * 0.01

    out = jax.block_until_ready(custom_td(x, weight, bias))

    # Reference check (plain JAX)
    ref = jnp.einsum("btd,od->bto", x, weight[:, 0, 0, :]) + bias[None, None, :]
    assert out.shape == (B, T, O)
    assert jnp.allclose(out, ref, atol=1e-5, rtol=1e-5)

    # Optional bf16-input path (f32 accumulation) — looser tolerance.
    out_bf16 = jax.block_until_ready(custom_td(x, weight, bias, use_bf16=True))
    assert jnp.allclose(out_bf16, ref, atol=2e-2, rtol=2e-2)

    # Exercise the K-tiled (reduction-grid) path by shrinking the VMEM budget so the
    # contraction axis must be tiled (validates the accumulator/pl.when pipeline).
    B2, T2, D2, O2 = 2, 64, 512, 256
    x_big = jax.random.normal(kx, (B2, T2, D2), dtype=jnp.float32)
    w_big = jax.random.normal(kw, (O2, 1, 1, D2), dtype=jnp.float32) * 0.02
    b_big = jax.random.normal(kb, (O2,), dtype=jnp.float32) * 0.01
    out_big = jax.block_until_ready(
        custom_td(x_big, w_big, b_big, vmem_budget_bytes=1 << 20))
    ref_big = jnp.einsum("btd,od->bto", x_big, w_big[:, 0, 0, :]) + b_big[None, None, :]
    assert jnp.allclose(out_big, ref_big, atol=5e-3, rtol=5e-3)

    print("KERNEL_OK")
</pallas_src>

<mosaic_0001>
module attributes {stable_mosaic.version = 11 : i64} {
  func.func @_td_kernel(%arg0: i32, %arg1: i32, %arg2: memref<8x32xf32, #tpu.memory_space<vmem>>, %arg3: memref<16x32xf32, #tpu.memory_space<vmem>>, %arg4: memref<1x16xf32, #tpu.memory_space<vmem>>, %arg5: memref<8x16xf32, #tpu.memory_space<vmem>>) attributes {dimension_semantics = [#tpu.dimension_semantics<parallel>, #tpu.dimension_semantics<parallel>], iteration_bounds = array<i64: 1, 2>, scalar_prefetch = 0 : i64, scratch_operands = 0 : i64, tpu.core_type = #tpu.core_type<tc>, window_params = [{transform_indices = @transform_0, window_bounds = array<i64: 8, 32>}, {transform_indices = @transform_1, window_bounds = array<i64: 16, 32>}, {transform_indices = @transform_2, window_bounds = array<i64: 1, 16>}, {transform_indices = @transform_3, window_bounds = array<i64: 8, 16>}]} {
    %c0 = arith.constant 0 : index
    %c0_0 = arith.constant 0 : index
    %0 = vector.load %arg2[%c0, %c0_0] : memref<8x32xf32, #tpu.memory_space<vmem>>, vector<8x32xf32>
    %c0_1 = arith.constant 0 : index
    %c0_2 = arith.constant 0 : index
    %1 = vector.load %arg3[%c0_1, %c0_2] : memref<16x32xf32, #tpu.memory_space<vmem>>, vector<16x32xf32>
    %cst = arith.constant dense<0.000000e+00> : vector<8x16xf32>
    %2 = tpu.matmul %0, %1, %cst {dimension_numbers = #tpu.dot_dimension_numbers<[1], [1], [0], [0], [0, 0, 1, 0], [], []>} : vector<8x32xf32>, vector<16x32xf32>, vector<8x16xf32> -> vector<8x16xf32>
    %c0_3 = arith.constant 0 : index
    %c0_4 = arith.constant 0 : index
    %3 = vector.load %arg4[%c0_3, %c0_4] : memref<1x16xf32, #tpu.memory_space<vmem>>, vector<1x16xf32>
    %4 = vector.broadcast %3 : vector<1x16xf32> to vector<8x16xf32>
    %5 = arith.addf %2, %4 : vector<8x16xf32>
    %c0_5 = arith.constant 0 : index
    %c0_6 = arith.constant 0 : index
    %6 = vector.load %arg5[%c0_5, %c0_6] : memref<8x16xf32, #tpu.memory_space<vmem>>, vector<8x16xf32>
    tpu.vector_store %arg5[%c0_5, %c0_6], %5 {strides = array<i32>} : memref<8x16xf32, #tpu.memory_space<vmem>>, vector<8x16xf32>,
    return
  }
  func.func @transform_0(%arg0: i32, %arg1: i32) -> (i32, i32) {
    %c0_i32 = arith.constant 0 : i32
    %c0_i32_0 = arith.constant 0 : i32
    return %arg1, %c0_i32 : i32, i32
  }
  func.func @transform_1(%arg0: i32, %arg1: i32) -> (i32, i32) {
    %c0_i32 = arith.constant 0 : i32
    %c0_i32_0 = arith.constant 0 : i32
    return %arg0, %c0_i32 : i32, i32
  }
  func.func @transform_2(%arg0: i32, %arg1: i32) -> (i32, i32) {
    %c0_i32 = arith.constant 0 : i32
    %c0_i32_0 = arith.constant 0 : i32
    return %c0_i32, %arg0 : i32, i32
  }
  func.func @transform_3(%arg0: i32, %arg1: i32) -> (i32, i32) {
    %c0_i32 = arith.constant 0 : i32
    return %arg1, %arg0 : i32, i32
  }
}

</mosaic_0001>

<bundles_post_ra>
// kernel: tpu_custom_call.1
= control target key start
LH: loop header
LB: loop body
LE: loop exit
PB: predicated region body
PF: predicated region fallthrough
CT: control target
= control target key end

     0   :  { %8 = vsyncpa [#allocation3], 0  ;;  %s951_s0 = inlined_call_operand.hbm [shape: f32[16,32], index: 0, kind: input, shape index: {}]   ;;  %s952_s1 = inlined_call_operand.hbm [shape: f32[16,32], index: 1, kind: input, shape index: {}]   ;;  %s953_s2 = inlined_call_operand.vmem [shape: f32[1,16], index: 2, kind: input, shape index: {}]   ;;  %s954_s3 = inlined_call_operand.hbm [shape: f32[16,16], index: 3, kind: output, shape index: {}]  }
   0x1   :  { %10 = vsyncpa [#allocation3 + $0x1], 0 }
   0x2   :  { %11 = vsyncpa [#allocation6], 0 }
   0x3   :  { %12 = vsyncpa [#allocation4], 0 }
   0x4   :  { %14 = vsyncpa [#allocation4 + $0x1], 0  ;;  %s734_s12 = smov 0   ;;  %s736_s13 = smov 0  }
   0x5   :  { %s738_s14 = smov 0   ;;  %s740_s15 = smov 0  }
   0x6   :  { %s742_s16 = smov 0   ;;  %s744_s17 = smov 0  }
   0x7 LB: > { %s448_s18 = sadd.s32 4294967295, %s704_s17   ;;  %s449_s19 = sadd.s32 4294967294, %s704_s17   ;;  %s704_s17 = sphi %s744_s17, %s20_s17   ;;  %s700_s16 = sphi %s742_s16, %s978_s16   ;;  %s696_s15 = sphi %s740_s15, %s977_s15   ;;  %s692_s14 = sphi %s738_s14, %s976_s14   ;;  %s688_s13 = sphi %s736_s13, %s975_s13   ;;  %s684_s12 = sphi %s734_s12, %s974_s12  }
   0x8   : > { %p52_p0 = scmp.ne.s32.totalorder %s688_s13, %s684_s12  ;;  %p768_p1 = scmp.eq.s32.totalorder %s448_s18, 0 }
   0x9   : > { %p772_p2 = scmp.eq.s32.totalorder %s448_s18, 1  ;;  %p136_p3 = scmp.eq.s32.totalorder %s449_s19, 1 }
   0xa   : > { %s959_s20 = scalar_select %p768_p1, 1, 0 }
   0xb   : > { %s960_s21 = scalar_select %p772_p2, 1, 0 }
   0xc   : > { %p778_p4 = por %p768_p1, %p52_p0  ;;  %p450_p5 = scmp.ge.s32.totalorder %s704_s17, 1 }
   0xd   : > { %p783_p6 = por %p136_p3, %p52_p0  ;;  %p143_p7 = scmp.lt.s32.totalorder %s704_s17, 3 }
   0xe   : > { %s961_s22 = scalar_select %p778_p4, 1, 0 }
   0xf   : > { %s962_s23 = scalar_select %p783_p6, 1, 0 }
  0x10   : > { %p788_p8 = pnand %p450_p5, %p143_p7  ;;  %s706_s25 = smov [#allocation5]  }
  0x11   : > { %s158_s26 = sshll.u32 %s706_s25, 4  ;;  %s29_s28 = sadd.s32 1, %s700_s16  ;;  %s159_s26 = int_to_ptr.vmem [resolvable:$true] %s158_s26 }
  0x12   : > { %s963_s24 = scalar_select %p788_p8, 1, 0 }
  0x13   : > { %p490_p9 = pneg %p788_p8  ;;  %s560_s4 = scalar_lea.hbm %s952_s1, 256 }
  0x14   : > { %p561_p12 = scmp.ne.s32.totalorder %s952_s1, %s560_s4  ;;  %p567_p5 = scmp.lt.u32.totalorder %s560_s4, %s952_s1 }
  0x15   : > { %p797_p11 = pnand %p490_p9, %p768_p1 }
  0x17   : > { %p562_p13 = pneg %p797_p11 }
  0x19   : > { %p563_p0 = pnand %p562_p13, %p561_p12 }
  0x1b   : > { %p564_p3 = pneg %p563_p0 }
  0x1d   : > { %p569_p7 = pnand %p567_p5, %p564_p3 }
  0x1f   : > { %572 = shalt.err (!%p569_p7)
}
  0x20   : > { %s573_s9 = scalar_lea.vmem %s159_s26, 256  ;;  %p581_p1 = scmp.lt.s32.totalorder %s159_s26, %s159_s26 }
  0x21   : > { %p574_p9 = scmp.ne.s32.totalorder %s159_s26, %s573_s9  ;;  %p582_p4 = scmp.lt.s32.totalorder %s573_s9, %s573_s9 }
  0x23   : > { %p576_p10 = pnand %p574_p9, %p562_p13  ;;  %p583_p8 = por %p582_p4, %p581_p1 }
  0x25   : > { %p577_p6 = pneg %p576_p10 }
  0x27   : > { %p584_p2 = pnand %p583_p8, %p577_p6 }
  0x29   : > { %587 = shalt.err (!%p584_p2)
}
  0x2a   : > { %s707_s10 = smov 128   ;;  %s708_s11 = smov 8  }
  0x2b   : > { %493 = dma.hbm_to_vmem [thread:$0]  (!%p797_p11), %s952_s1, 256, %s159_s26, [#allocation6], %s707_s10, %s707_s10, %s708_s11  }
  0x2c   : > { %p30_p1 = scmp.ge.s32.totalorder %s29_s28, 2  ;;  %s39_s25 = sadd.s32 1, %s692_s14 }
  0x2d   : > { %p46_p2 = scmp.ne.s32.totalorder %s692_s14, %s688_s13  ;;  %p47_p4 = scmp.eq.s32.totalorder %s704_s17, 0 }
  0x2e   : > { %s980_s28 = smov (%p30_p1, %s29_s28), 0  ;;  %p966_p8 = scmp.ne.s32.totalorder %s960_s21, 0 }
  0x2f   : > { %p824_p6 = por %p47_p4, %p46_p2  ;;  %s36_s27 = ssub.s32 %s700_s16, %s980_s28 }
  0x30   : > { %p830_p10 = por %p966_p8, %p46_p2  ;;  %p503_p12 = scmp.lt.s32.totalorder %s704_s17, 2 }
  0x31   : > { %p37_p11 = scmp.eq.s32.totalorder %s36_s27, 0  ;;  %s178_s26 = sand.u32 1, %s692_s14  }
  0x32   : > { %s454_s4 = sshll.u32 %s178_s26, 3  ;;  %s455_s6 = sshll.u32 %s700_s16, 7 }
  0x33   : > { %s839_s5 = scalar_select %p37_p11, %s692_s14, %s39_s25  }
  0x34   : > { %s845_s9 = scalar_lea.hbm %s951_s0, %s455_s6  ;;  %s182_s21 = scalar_lea.vmem [#allocation2], %s454_s4 }
  0x35   : > { %s189_s10 = sshll.u32 %s182_s21, 4  ;;  %p851_p13 = pnand %p503_p12, %p824_p6  ;;  %s847_s10 = int_to_ptr.vmem [resolvable:$true] %s189_s10 }
  0x36   : > { %s179_s18 = scalar_lea.sflag [#allocation3], %s178_s26  ;;  %s588_s19 = scalar_lea.hbm %s845_s9, 128 }
  0x37   : > { %p589_p0 = scmp.ne.s32.totalorder %s845_s9, %s588_s19  ;;  %p590_p3 = pneg %p851_p13 }
  0x38   : > { %s593_s4 = scalar_lea.hbm %s951_s0, 256  ;;  %p594_p9 = scmp.lt.u32.totalorder %s845_s9, %s951_s0 }
  0x39   : > { %p591_p5 = pnand %p590_p3, %p589_p0  ;;  %p595_p1 = scmp.lt.u32.totalorder %s593_s4, %s588_s19 }
  0x3a   : > { %p597_p4 = scmp.lt.u32.totalorder %s588_s19, %s845_s9 }
  0x3b   : > { %p592_p7 = pneg %p591_p5  ;;  %p596_p2 = por %p595_p1, %p594_p9 }
  0x3d   : > { %p598_p6 = por %p597_p4, %p596_p2 }
  0x3f   : > { %p599_p8 = pnand %p598_p6, %p592_p7 }
  0x41   : > { %602 = shalt.err (!%p599_p8)
}
  0x42   : > { %s603_s26 = scalar_lea.vmem %s847_s10, 128  ;;  %s709_s7 = smov [#allocation2]  }
  0x43   : > { %p604_p12 = scmp.ne.s32.totalorder %s847_s10, %s603_s26  ;;  %s608_s8 = sshll.u32 %s709_s7, 4  ;;  %s609_s8 = int_to_ptr.vmem [resolvable:$false] %s608_s8 }
  0x44   : > { %s610_s21 = scalar_lea.vmem %s609_s8, 256  ;;  %p611_p5 = scmp.lt.s32.totalorder %s847_s10, %s609_s8 }
  0x45   : > { %p606_p11 = pnand %p604_p12, %p590_p3  ;;  %p612_p9 = scmp.lt.s32.totalorder %s610_s21, %s603_s26 }
  0x47   : > { %p607_p0 = pneg %p606_p11  ;;  %p613_p1 = por %p612_p9, %p611_p5 }
  0x49   : > { %p614_p2 = pnand %p613_p1, %p607_p0 }
  0x4b   : > { %617 = shalt.err (!%p614_p2)
}
  0x4c   : > { %497 = dma.hbm_to_vmem [thread:$0]  (!%p851_p13), %s845_s9, 128, %s847_s10, %s179_s18  }
  0x4d   : > { %p969_p7 = scmp.ne.s32.totalorder %s963_s24, 0 }
  0x4e   : > { %s883_s19 = sand.u32 (!%p969_p7), 1, %s688_s13   ;;  %p970_p3 = scmp.ne.s32.totalorder (!%p969_p7), %s961_s22, 0 }
  0x4f   : > { %198 = sbr.rel (%p969_p7) target bundleno = 329 (0x149), region = 32  ;;  %s457_s25 = sshll.u32 (!%p969_p7), %s883_s19, 3 }
  0x50   : > { %s201_s27 = scalar_lea.sflag (!%p969_p7), [#allocation3], %s883_s19  ;;  %s204_s4 = scalar_lea.vmem (!%p969_p7), [#allocation2], %s457_s25 }
  0x56   : > { %671 = dma.done.wait (%p970_p3), %s201_s27, 128  }
  0x57   : > { %673 = vsyncadd (%p970_p3), %s201_s27, 4294967168  ;;  %p971_p4 = scmp.ne.s32.totalorder %s959_s20, 0 }
  0x59   : > { %675 = dma.done.wait (%p971_p4), [#allocation6], 256  }
  0x5a   : > { %677 = vsyncadd (%p971_p4), [#allocation6], 4294967040  ;;  %v710_v0 = vmov 0.0|0.0   ;;  %vm711_vm0 = vmmov 0   ;;  %v712_v1 = vmov 0.0   ;;  %vm248_vm1 = vcmask 261120  }
  0x5b   : > { %478 = vmatprep.subr.bf16.mxu0 %v710_v0  ;;  %475 = vmatprep.mubr.msk.f32.mxu0 %vm711_vm0, %v712_v1  ;;  %v239_v2 = vld [vmem:[#allocation5] sm:$0xff]  ;;  %v240_v3 = vld [vmem:[#allocation5 + $0x8] sm:$0xff]  ;;  %vm480_vm2 = vmpackc.low %vm248_vm1, %vm248_vm1  ;;  %s465_s20 = sshll.u32 %s696_s15, 7  ;;  %s233_s9 = scalar_lea.vmem [#allocation7], %s457_s25  ;;  %vm328_vm3 = vcmask 130048  }
  0x5c   : > { %v479_v4 = vpack.c.bf16 %v240_v3, %v239_v2  ;;  %v238_v5 = vld [vmem:[%s204_s4] sm:$0xff]  ;;  %s345_s10 = sshll.u32 %s233_s9, 4  ;;  %s902_s29 = scalar_lea.hbm %s954_s3, %s465_s20  ;;  %s904_s10 = int_to_ptr.vmem [resolvable:$true] %s345_s10 }
  0x5d   : > { %v460_v6 = vld [vmem:[%s953_s2] ss:$0 sm:$0xff]  ;;  %s331_s6 = scalar_lea.sflag [#allocation4], %s883_s19  ;;  %s618_s26 = scalar_lea.vmem %s904_s10, 128 }
  0x5e   : > { %481 = vmatpush3.bf16.xpose.msk.msra.mxu0 %vm480_vm2, %v479_v4  ;;  %p619_p13 = scmp.ne.s32.totalorder %s904_s10, %s618_s26  ;;  %s713_s15 = smov [#allocation7]  }
  0x5f   : > { %s622_s7 = sshll.u32 %s713_s15, 4  ;;  %s623_s7 = int_to_ptr.vmem [resolvable:$false] %s622_s7 }
  0x60   : > { %p620_p6 = pnand %p619_p13, %p830_p10  ;;  %s624_s8 = scalar_lea.vmem %s623_s7, 256 }
  0x61   : > { %p625_p12 = scmp.lt.s32.totalorder %s904_s10, %s623_s7  ;;  %p626_p11 = scmp.lt.s32.totalorder %s624_s8, %s618_s26 }
  0x62   : > { %p621_p8 = pneg %p620_p6 }
  0x63   : > { %p627_p0 = por %p626_p11, %p625_p12 }
  0x65   : > { %476 = vmatmul.mubr.msk.f32.vlgmr.msra.gmra.mrb[0].mxu0 %vm248_vm1, %v238_v5  ;;  %p628_p5 = pnand %p627_p0, %p621_p8 }
 0x138   : > { %v324_v7 = vpop.f32.mrb[0].mxu0 }
 0x139   : > { %v325_v8 = vadd.f32 %v460_v6, %v324_v7  ;;  %v477_v9 = vpop.f32.mrb[1].mxu0 }
 0x13b   : > { %329 = vst.msk [vmem:[%s233_s9] sm:$0xff] %vm328_vm3, %v325_v8 }
 0x13c   : > { %631 = shalt.err (!%p628_p5)
}
 0x13d   : > { %s632_s21 = scalar_lea.hbm %s902_s29, 128  ;;  %s636_s27 = scalar_lea.hbm %s954_s3, 256 }
 0x13e   : > { %p633_p9 = scmp.ne.s32.totalorder %s902_s29, %s632_s21  ;;  %p637_p7 = scmp.lt.u32.totalorder %s902_s29, %s954_s3 }
 0x13f   : > { %p638_p3 = scmp.lt.u32.totalorder %s636_s27, %s632_s21  ;;  %p640_p13 = scmp.lt.u32.totalorder %s632_s21, %s902_s29 }
 0x140   : > { %p634_p1 = pnand %p633_p9, %p830_p10 }
 0x141   : > { %p639_p4 = por %p638_p3, %p637_p7 }
 0x142   : > { %p635_p2 = pneg %p634_p1 }
 0x143   : > { %p641_p6 = por %p640_p13, %p639_p4 }
 0x145   : > { %p642_p8 = pnand %p641_p6, %p635_p2 }
 0x147   : > { %645 = shalt.err (!%p642_p8)
}
 0x148   : > { %488 = dma.vmem_to_hbm [thread:$0]  (%p830_p10), %s904_s10, 128, %s902_s29, %s331_s6  }
 0x149 PF: > { %s357_s24 = sand.u32 1, %s684_s12   ;;  %p972_p12 = scmp.ne.s32.totalorder %s962_s23, 0 }
 0x14a   : > { %p973_p11 = scmp.ge.s32.totalorder %s704_s17, 2  ;;  %s358_s20 = scalar_lea.sflag [#allocation4], %s357_s24 }
 0x14c   : > { %p499_p0 = pnand %p973_p11, %p972_p12 }
 0x14e   : > { %679 = dma.done.wait (!%p499_p0), %s358_s20, 128  }
 0x14f   : > { %681 = vsyncadd (!%p499_p0), %s358_s20, 4294967168  ;;  %s20_s17 = sadd.s32 1, %s704_s17   ;;  %s974_s12 = smov %s688_s13 }
 0x150   : > { %p17_p5 = scmp.ge.s32.totalorder %s20_s17, 4   ;;  %s975_s13 = smov %s692_s14 }
 0x151   : > { %s976_s14 = smov %s839_s5  ;;  %s977_s15 = smov %s700_s16 }
 0x152   : > { %s978_s16 = smov %s980_s28  ;;  %19 = sbr.rel (!%p17_p5) target bundleno = 7 (0x7), region = 85 }
 0x159   :  { %363 = vsyncpa [#allocation3], 1 }
 0x15a   :  { %365 = vsyncpa [#allocation3 + $0x1], 1 }
 0x15b   :  { %366 = vsyncpa [#allocation6], 1 }
 0x15c   :  { %367 = vsyncpa [#allocation4], 1 }
 0x15d   :  { %369 = vsyncpa [#allocation4 + $0x1], 1 }

</bundles_post_ra>
